<compile_context>
chip_gen: v7x
topology: tpu7x:2x2x1
jax: 0.10.0
libtpu: 0.0.40
codegen_flags: <defaults>
</compile_context>

<pallas_src>
import jax
import jax.numpy as jnp
from jax import lax
from jax.experimental import pallas as pl
from jax.experimental.pallas import tpu as pltpu


# ---------------------------------------------------------------------------
# Kernel
# ---------------------------------------------------------------------------
def _head_kernel(x_ref, wqkv_ref, o_ref):
    """One grid step processes a block of `Bb` batch elements.

    x_ref:    (Bb*T, C)  flattened activations (native dtype, never upcast)
    wqkv_ref: (C, 3H)    fused [W_q * H**-0.5 | W_k | W_v] projection weights
    o_ref:    (Bb, T*H)  lane-dense output slab (T*H == 128 at module shapes)
    """
    Bb, TH = o_ref.shape
    H = wqkv_ref.shape[1] // 3
    T = TH // H

    x = x_ref[...]                      # keep native dtype (bf16 MXU-friendly)
    w = wqkv_ref[...]

    # Fused QKV projection as a single 2D MXU matmul: M = Bb*T rows, N = 3H
    # lanes, f32 accumulation.
    qkv = jnp.dot(x, w, preferred_element_type=jnp.float32)     # (Bb*T, 3H)

    # 1/sqrt(H) is already folded into W_q at parameter-prep time.
    q = qkv[:, 0 * H:1 * H].reshape(Bb, T, H)
    k = qkv[:, 1 * H:2 * H].reshape(Bb, T, H)
    v = qkv[:, 2 * H:3 * H].reshape(Bb, T, H)

    # Scores (Bb, T, T): contract the head dims directly (no XLU transpose).
    wei = lax.dot_general(q, k, (((2,), (2,)), ((0,), (0,))),
                          preferred_element_type=jnp.float32)

    # Causal mask with a large finite negative (robust even for a fully
    # masked row, unlike -inf which would yield NaN after the max-subtract).
    row = lax.broadcasted_iota(jnp.int32, (T, T), 0)
    col = lax.broadcasted_iota(jnp.int32, (T, T), 1)
    wei = jnp.where((col <= row)[None, :, :], wei, jnp.float32(-1e30))

    # Numerically stable softmax in f32 with an exact divide (matches the
    # PyTorch reference tightly; the approx reciprocal cost accuracy before).
    m = jnp.max(wei, axis=-1, keepdims=True)
    p = jnp.exp(wei - m)
    p = p / jnp.sum(p, axis=-1, keepdims=True)

    # TODO(synk): dropout on `p` is a no-op (eval / p == 0.0).

    # Cast probs / values back to the input dtype before the PV matmul
    # (halves MXU passes and vreg pressure for bf16 models); accumulate f32.
    out = lax.dot_general(p.astype(x_ref.dtype), v.astype(x_ref.dtype),
                          (((2,), (1,)), ((0,), (0,))),
                          preferred_element_type=jnp.float32)   # (Bb, T, H)

    # Lane-dense store: lay each batch element's (T, H) result out as one
    # T*H-wide row so the output block / HBM slab is dense (128 lanes at the
    # module shapes) instead of a padded, masked 16-lane-wide layout.
    for t in range(T):                  # static unroll; T == block_size (8)
        o_ref[:, t * H:(t + 1) * H] = out[:, t, :].astype(o_ref.dtype)


# ---------------------------------------------------------------------------
# Block-size / VMEM heuristics
# ---------------------------------------------------------------------------
def _num_tensorcores() -> int:
    """TensorCores per chip (v5e/v6e: 1, v7x: 2); conservative default 1."""
    try:
        info = pltpu.get_tpu_info()
        for name in ("num_cores", "core_count", "num_tensorcores",
                     "tensor_cores_per_chip"):
            n = getattr(info, name, None)
            if n:
                return int(n)
    except Exception:
        pass
    try:
        n = getattr(jax.devices()[0], "num_cores", None)
        if n:
            return int(n)
    except Exception:
        pass
    return 1


def _block_vmem_bytes(bb: int, T: int, C: int, H: int, itemsize: int) -> int:
    """Rough per-step VMEM footprint (double-buffered blocks + f32 temps)."""
    x_b = 2 * bb * T * C * itemsize           # input block, double-buffered
    o_b = 2 * bb * T * H * itemsize           # output block, double-buffered
    w_b = 2 * C * 3 * H * itemsize            # fused weights
    f32_tmp = 4 * bb * T * (3 * H + 2 * T + H)  # qkv + scores + probs + out
    return x_b + o_b + w_b + f32_tmp


def _pick_block_b(B: int, T: int, C: int, H: int, itemsize: int) -> int:
    """Batch elements per grid step.

    On 1-TC chips (v5e/v6e) the grid is a sequential loop, so use a single
    grid step (block_b = B).  On multi-TC chips (v7x) keep >= num_cores
    parallel steps for megacore sharding, subject to a VMEM cap (v7x has only
    64 MiB physical VMEM).
    """
    def valid(bb):
        # grid must tile B evenly; the output block's sublane dim must be a
        # multiple of 8 or the full dim (the (8,128) BlockSpec rule).
        return bb >= 1 and B % bb == 0 and (bb % 8 == 0 or bb == B)

    block_b = B
    cores = _num_tensorcores()
    if cores >= 2:
        for bb in range(max(1, B // cores), 0, -1):
            if valid(bb):
                block_b = bb
                break

    budget = 12 * 1024 * 1024   # stay well below every chip's scoped VMEM
    while _block_vmem_bytes(block_b, T, C, H, itemsize) > budget:
        nxt = next((bb for bb in range(block_b - 1, 0, -1) if valid(bb)), None)
        if nxt is None:
            break
        block_b = nxt
    return block_b


# ---------------------------------------------------------------------------
# Parameter prep (one-time, hoisted out of the per-call wrapper)
# ---------------------------------------------------------------------------
def prepare_head_weights(w_key, w_query, w_value, dtype=None):
    """Fold 1/sqrt(H) into W_q and fuse [q | k | v] into a single (C, 3H)
    weight.  Do this once at parameter-prep time, not per forward call."""
    H = w_key.shape[1]
    dtype = dtype if dtype is not None else w_query.dtype
    w_q_scaled = w_query * (float(H) ** -0.5)
    return jnp.concatenate([w_q_scaled, w_key, w_value], axis=1).astype(dtype)


# ---------------------------------------------------------------------------
# Forward wrapper
# ---------------------------------------------------------------------------
@jax.jit
def head_forward(x, w_qkv):
    """x: (B, T, C); w_qkv: (C, 3H) from prepare_head_weights. -> (B, T, H)."""
    B, T, C = x.shape
    H = w_qkv.shape[1] // 3
    if w_qkv.dtype != x.dtype:
        w_qkv = w_qkv.astype(x.dtype)

    itemsize = jnp.dtype(x.dtype).itemsize
    block_b = _pick_block_b(B, T, C, H, itemsize)
    grid = (B // block_b,)

    vmem_limit = int(min(max(4 * _block_vmem_bytes(block_b, T, C, H, itemsize),
                             8 * 1024 * 1024),
                         32 * 1024 * 1024))

    cost = pl.CostEstimate(
        flops=2 * B * T * (C * 3 * H + 2 * T * H),
        transcendentals=B * T * T,
        bytes_accessed=(B * T * C + C * 3 * H + B * T * H) * itemsize)

    # Present the projection as a plain 2D matmul: M = B*T rows.
    x_flat = x.reshape(B * T, C)

    out_flat = pl.pallas_call(
        _head_kernel,
        out_shape=jax.ShapeDtypeStruct((B, T * H), x.dtype),
        grid_spec=pltpu.PrefetchScalarGridSpec(
            num_scalar_prefetch=0,
            grid=grid,
            in_specs=[
                pl.BlockSpec((block_b * T, C), lambda b: (b, 0)),
                pl.BlockSpec((C, 3 * H), lambda b: (0, 0)),
            ],
            out_specs=pl.BlockSpec((block_b, T * H), lambda b: (b, 0)),
        ),
        compiler_params=pltpu.CompilerParams(
            dimension_semantics=("parallel",),
            vmem_limit_bytes=vmem_limit),
        cost_estimate=cost,
    )(x_flat, w_qkv)

    # Row-major view back to (B, T, H); free reshape in the wrapper.
    return out_flat.reshape(B, T, H)


# ---------------------------------------------------------------------------
# Pure-JAX reference (matches the PyTorch forward; dropout = identity)
# ---------------------------------------------------------------------------
def reference_head(x, w_key, w_query, w_value):
    k = x @ w_key
    q = x @ w_query
    v = x @ w_value
    scale = k.shape[-1] ** -0.5
    wei = jnp.einsum("btd,bsd->bts", q, k) * scale
    T = x.shape[1]
    tril = jnp.tril(jnp.ones((T, T), dtype=bool))
    wei = jnp.where(tril, wei, -jnp.inf)
    wei = jax.nn.softmax(wei, axis=-1)
    return wei @ v


if __name__ == "__main__":
    # Shapes consistent with the module:
    #   batch B=2, seq T=8 (block_size), embed C=32 (n_embd), head_size H=16
    B, T, C, H = 2, 8, 32, 16

    key = jax.random.PRNGKey(0)
    kx, kk, kq, kv = jax.random.split(key, 4)

    x = jax.random.normal(kx, (B, T, C), dtype=jnp.float32)
    w_key = jax.random.normal(kk, (C, H), dtype=jnp.float32) * (C ** -0.5)
    w_query = jax.random.normal(kq, (C, H), dtype=jnp.float32) * (C ** -0.5)
    w_value = jax.random.normal(kv, (C, H), dtype=jnp.float32) * (C ** -0.5)

    # One-time parameter prep (weight fusion + scale fold).
    w_qkv = prepare_head_weights(w_key, w_query, w_value)

    out = jax.block_until_ready(head_forward(x, w_qkv))
    ref = reference_head(x, w_key, w_query, w_value)
    assert out.shape == (B, T, H), out.shape
    assert jnp.allclose(out, ref, atol=1e-2, rtol=1e-2), (
        float(jnp.max(jnp.abs(out - ref))))

    # Larger batch: exercises the multi-example-per-step / grid-splitting path.
    B2 = 16
    x2 = jax.random.normal(jax.random.PRNGKey(1), (B2, T, C), dtype=jnp.float32)
    out2 = jax.block_until_ready(head_forward(x2, w_qkv))
    ref2 = reference_head(x2, w_key, w_query, w_value)
    assert out2.shape == (B2, T, H), out2.shape
    assert jnp.allclose(out2, ref2, atol=1e-2, rtol=1e-2), (
        float(jnp.max(jnp.abs(out2 - ref2))))

    # bf16 path (recommended operand dtype on v6e/v7x; softmax stays in f32).
    w_qkv_bf16 = prepare_head_weights(w_key, w_query, w_value,
                                      dtype=jnp.bfloat16)
    out_bf16 = jax.block_until_ready(
        head_forward(x2.astype(jnp.bfloat16), w_qkv_bf16))
    assert out_bf16.shape == (B2, T, H), out_bf16.shape
    assert jnp.allclose(out_bf16.astype(jnp.float32), ref2,
                        atol=1e-1, rtol=1e-1), (
        float(jnp.max(jnp.abs(out_bf16.astype(jnp.float32) - ref2))))

    print("KERNEL_OK")
</pallas_src>

<mosaic_0001>
module attributes {stable_mosaic.version = 11 : i64} {
  func.func @_head_kernel(%arg0: i32, %arg1: memref<16x32xf32, #tpu.memory_space<vmem>>, %arg2: memref<32x48xf32, #tpu.memory_space<vmem>>, %arg3: memref<2x128xf32, #tpu.memory_space<vmem>>) attributes {dimension_semantics = [#tpu.dimension_semantics<parallel>], iteration_bounds = array<i64: 1>, scalar_prefetch = 0 : i64, scratch_operands = 0 : i64, tpu.core_type = #tpu.core_type<tc>, window_params = [{transform_indices = @transform_0, window_bounds = array<i64: 16, 32>}, {pipeline_mode = #tpu.pipeline_mode<synchronous>, transform_indices = @transform_1, window_bounds = array<i64: 32, 48>}, {transform_indices = @transform_2, window_bounds = array<i64: 2, 128>}]} {
    %c0 = arith.constant 0 : index
    %c0_0 = arith.constant 0 : index
    %0 = vector.load %arg1[%c0, %c0_0] : memref<16x32xf32, #tpu.memory_space<vmem>>, vector<16x32xf32>
    %c0_1 = arith.constant 0 : index
    %c0_2 = arith.constant 0 : index
    %1 = vector.load %arg2[%c0_1, %c0_2] : memref<32x48xf32, #tpu.memory_space<vmem>>, vector<32x48xf32>
    %cst = arith.constant dense<0.000000e+00> : vector<16x48xf32>
    %2 = tpu.matmul %0, %1, %cst {dimension_numbers = #tpu.dot_dimension_numbers<[1], [0], [0], [1], [0, 0, 1, 1], [], []>} : vector<16x32xf32>, vector<32x48xf32>, vector<16x48xf32> -> vector<16x48xf32>
    %3 = vector.extract_strided_slice %2 {offsets = [0, 0], sizes = [16, 16], strides = [1, 1]} : vector<16x48xf32> to vector<16x16xf32>
    %4 = vector.shape_cast %3 : vector<16x16xf32> to vector<2x8x16xf32>
    %5 = vector.extract_strided_slice %2 {offsets = [0, 16], sizes = [16, 16], strides = [1, 1]} : vector<16x48xf32> to vector<16x16xf32>
    %6 = vector.shape_cast %5 : vector<16x16xf32> to vector<2x8x16xf32>
    %7 = vector.extract_strided_slice %2 {offsets = [0, 32], sizes = [16, 16], strides = [1, 1]} : vector<16x48xf32> to vector<16x16xf32>
    %8 = vector.shape_cast %7 : vector<16x16xf32> to vector<2x8x16xf32>
    %cst_3 = arith.constant dense<0.000000e+00> : vector<2x8x8xf32>
    %9 = tpu.matmul %4, %6, %cst_3 {dimension_numbers = #tpu.dot_dimension_numbers<[2], [2], [1], [1], [0, 0, 0, 1, 1, 1], [0], [0]>} : vector<2x8x16xf32>, vector<2x8x16xf32>, vector<2x8x8xf32> -> vector<2x8x8xf32>
    %10 = tpu.iota {dimensions = array<i32: 0>} : vector<8x8xi32>
    %11 = tpu.iota {dimensions = array<i32: 1>} : vector<8x8xi32>
    %12 = arith.cmpi sle, %11, %10 : vector<8x8xi32>
    %13 = vector.shape_cast %12 : vector<8x8xi1> to vector<1x8x8xi1>
    %cst_4 = arith.constant -1.000000e+30 : f32
    %14 = vector.shape_cast %13 : vector<1x8x8xi1> to vector<1x8x8xi1>
    %15 = vector.broadcast %14 : vector<1x8x8xi1> to vector<2x8x8xi1>
    %16 = vector.broadcast %cst_4 : f32 to vector<2x8x8xf32>
    %17 = arith.select %15, %9, %16 : vector<2x8x8xi1>, vector<2x8x8xf32>
    %cst_5 = arith.constant dense<0xFF800000> : vector<2x8xf32>
    %18 = vector.multi_reduction <maximumf>, %17, %cst_5 [2] : vector<2x8x8xf32> to vector<2x8xf32>
    %19 = vector.shape_cast %18 : vector<2x8xf32> to vector<2x8x1xf32>
    %20 = vector.broadcast %19 : vector<2x8x1xf32> to vector<2x8x8xf32>
    %21 = arith.subf %17, %20 : vector<2x8x8xf32>
    %22 = math.exp %21 : vector<2x8x8xf32>
    %cst_6 = arith.constant dense<0.000000e+00> : vector<2x8xf32>
    %23 = vector.multi_reduction <add>, %22, %cst_6 [2] : vector<2x8x8xf32> to vector<2x8xf32>
    %24 = vector.shape_cast %23 : vector<2x8xf32> to vector<2x8x1xf32>
    %25 = vector.broadcast %24 : vector<2x8x1xf32> to vector<2x8x8xf32>
    %26 = arith.divf %22, %25 : vector<2x8x8xf32>
    %cst_7 = arith.constant dense<0.000000e+00> : vector<2x8x16xf32>
    %27 = tpu.matmul %26, %8, %cst_7 {dimension_numbers = #tpu.dot_dimension_numbers<[2], [1], [1], [2], [0, 0, 0, 1, 1, 2], [0], [0]>} : vector<2x8x8xf32>, vector<2x8x16xf32>, vector<2x8x16xf32> -> vector<2x8x16xf32>
    %28 = vector.extract_strided_slice %27 {offsets = [0, 0, 0], sizes = [2, 1, 16], strides = [1, 1, 1]} : vector<2x8x16xf32> to vector<2x1x16xf32>
    %29 = vector.shape_cast %28 : vector<2x1x16xf32> to vector<2x16xf32>
    %c0_8 = arith.constant 0 : index
    %c0_9 = arith.constant 0 : index
    %30 = vector.load %arg3[%c0_8, %c0_9] : memref<2x128xf32, #tpu.memory_space<vmem>>, vector<2x16xf32>
    tpu.vector_store %arg3[%c0_8, %c0_9], %29 {strides = array<i32>} : memref<2x128xf32, #tpu.memory_space<vmem>>, vector<2x16xf32>,
    %31 = vector.extract_strided_slice %27 {offsets = [0, 1, 0], sizes = [2, 1, 16], strides = [1, 1, 1]} : vector<2x8x16xf32> to vector<2x1x16xf32>
    %32 = vector.shape_cast %31 : vector<2x1x16xf32> to vector<2x16xf32>
    %c0_10 = arith.constant 0 : index
    %c16 = arith.constant 16 : index
    %33 = vector.load %arg3[%c0_10, %c16] : memref<2x128xf32, #tpu.memory_space<vmem>>, vector<2x16xf32>
    tpu.vector_store %arg3[%c0_10, %c16], %32 {strides = array<i32>} : memref<2x128xf32, #tpu.memory_space<vmem>>, vector<2x16xf32>,
    %34 = vector.extract_strided_slice %27 {offsets = [0, 2, 0], sizes = [2, 1, 16], strides = [1, 1, 1]} : vector<2x8x16xf32> to vector<2x1x16xf32>
    %35 = vector.shape_cast %34 : vector<2x1x16xf32> to vector<2x16xf32>
    %c0_11 = arith.constant 0 : index
    %c32 = arith.constant 32 : index
    %36 = vector.load %arg3[%c0_11, %c32] : memref<2x128xf32, #tpu.memory_space<vmem>>, vector<2x16xf32>
    tpu.vector_store %arg3[%c0_11, %c32], %35 {strides = array<i32>} : memref<2x128xf32, #tpu.memory_space<vmem>>, vector<2x16xf32>,
    %37 = vector.extract_strided_slice %27 {offsets = [0, 3, 0], sizes = [2, 1, 16], strides = [1, 1, 1]} : vector<2x8x16xf32> to vector<2x1x16xf32>
    %38 = vector.shape_cast %37 : vector<2x1x16xf32> to vector<2x16xf32>
    %c0_12 = arith.constant 0 : index
    %c48 = arith.constant 48 : index
    %39 = vector.load %arg3[%c0_12, %c48] : memref<2x128xf32, #tpu.memory_space<vmem>>, vector<2x16xf32>
    tpu.vector_store %arg3[%c0_12, %c48], %38 {strides = array<i32>} : memref<2x128xf32, #tpu.memory_space<vmem>>, vector<2x16xf32>,
    %40 = vector.extract_strided_slice %27 {offsets = [0, 4, 0], sizes = [2, 1, 16], strides = [1, 1, 1]} : vector<2x8x16xf32> to vector<2x1x16xf32>
    %41 = vector.shape_cast %40 : vector<2x1x16xf32> to vector<2x16xf32>
    %c0_13 = arith.constant 0 : index
    %c64 = arith.constant 64 : index
    %42 = vector.load %arg3[%c0_13, %c64] : memref<2x128xf32, #tpu.memory_space<vmem>>, vector<2x16xf32>
    tpu.vector_store %arg3[%c0_13, %c64], %41 {strides = array<i32>} : memref<2x128xf32, #tpu.memory_space<vmem>>, vector<2x16xf32>,
    %43 = vector.extract_strided_slice %27 {offsets = [0, 5, 0], sizes = [2, 1, 16], strides = [1, 1, 1]} : vector<2x8x16xf32> to vector<2x1x16xf32>
    %44 = vector.shape_cast %43 : vector<2x1x16xf32> to vector<2x16xf32>
    %c0_14 = arith.constant 0 : index
    %c80 = arith.constant 80 : index
    %45 = vector.load %arg3[%c0_14, %c80] : memref<2x128xf32, #tpu.memory_space<vmem>>, vector<2x16xf32>
    tpu.vector_store %arg3[%c0_14, %c80], %44 {strides = array<i32>} : memref<2x128xf32, #tpu.memory_space<vmem>>, vector<2x16xf32>,
    %46 = vector.extract_strided_slice %27 {offsets = [0, 6, 0], sizes = [2, 1, 16], strides = [1, 1, 1]} : vector<2x8x16xf32> to vector<2x1x16xf32>
    %47 = vector.shape_cast %46 : vector<2x1x16xf32> to vector<2x16xf32>
    %c0_15 = arith.constant 0 : index
    %c96 = arith.constant 96 : index
    %48 = vector.load %arg3[%c0_15, %c96] : memref<2x128xf32, #tpu.memory_space<vmem>>, vector<2x16xf32>
    tpu.vector_store %arg3[%c0_15, %c96], %47 {strides = array<i32>} : memref<2x128xf32, #tpu.memory_space<vmem>>, vector<2x16xf32>,
    %49 = vector.extract_strided_slice %27 {offsets = [0, 7, 0], sizes = [2, 1, 16], strides = [1, 1, 1]} : vector<2x8x16xf32> to vector<2x1x16xf32>
    %50 = vector.shape_cast %49 : vector<2x1x16xf32> to vector<2x16xf32>
    %c0_16 = arith.constant 0 : index
    %c112 = arith.constant 112 : index
    %51 = vector.load %arg3[%c0_16, %c112] : memref<2x128xf32, #tpu.memory_space<vmem>>, vector<2x16xf32>
    tpu.vector_store %arg3[%c0_16, %c112], %50 {strides = array<i32>} : memref<2x128xf32, #tpu.memory_space<vmem>>, vector<2x16xf32>,
    return
  }
  func.func @transform_0(%arg0: i32) -> (i32, i32) {
    %c0_i32 = arith.constant 0 : i32
    %c0_i32_0 = arith.constant 0 : i32
    return %arg0, %c0_i32 : i32, i32
  }
  func.func @transform_1(%arg0: i32) -> (i32, i32) {
    %c0_i32 = arith.constant 0 : i32
    %c0_i32_0 = arith.constant 0 : i32
    %c0_i32_1 = arith.constant 0 : i32
    return %c0_i32, %c0_i32_0 : i32, i32
  }
  func.func @transform_2(%arg0: i32) -> (i32, i32) {
    %c0_i32 = arith.constant 0 : i32
    %c0_i32_0 = arith.constant 0 : i32
    return %arg0, %c0_i32 : i32, i32
  }
}

</mosaic_0001>

<bundles_post_ra>
// kernel: head_forward.1
= control target key start
LH: loop header
LB: loop body
LE: loop exit
PB: predicated region body
PF: predicated region fallthrough
CT: control target
= control target key end

     0   :  { %7 = vsyncpa [#allocation3], 0  ;;  %s758_s0 = inlined_call_operand.hbm [shape: f32[16,32], index: 0, kind: input, shape index: {}]   ;;  %s759_s1 = inlined_call_operand.hbm [shape: f32[32,48], index: 1, kind: input, shape index: {}]   ;;  %s760_s2 = inlined_call_operand.vmem [shape: f32[2,128], index: 2, kind: output, shape index: {}]  }
   0x1   :  { %8 = vsyncpa [#allocation5], 0  ;;  %s662_s9 = smov [#allocation2]   ;;  %s614_s13 = scalar_lea.hbm %s758_s0, 256 }
   0x2   :  { %s14_s10 = sshll.u32 %s662_s9, 4  ;;  %p615_p0 = scmp.ne.s32.totalorder %s758_s0, %s614_s13  ;;  %s15_s10 = int_to_ptr.vmem [resolvable:$true] %s14_s10 }
   0x3   :  { %p618_p1 = scmp.lt.u32.totalorder %s614_s13, %s758_s0 }
   0x5   :  { %p620_p2 = pnand %p618_p1, %p615_p0 }
   0x7   :  { %623 = shalt.err (!%p620_p2)
}
   0x8   :  { %s624_s18 = scalar_lea.vmem %s15_s10, 256  ;;  %p629_p4 = scmp.lt.s32.totalorder %s15_s10, %s15_s10 }
   0x9   :  { %p625_p3 = scmp.ne.s32.totalorder %s15_s10, %s624_s18  ;;  %p630_p5 = scmp.lt.s32.totalorder %s624_s18, %s624_s18 }
   0xb   :  { %p631_p6 = por %p630_p5, %p629_p4 }
   0xd   :  { %p632_p7 = pnand %p631_p6, %p625_p3 }
   0xf   :  { %635 = shalt.err (!%p632_p7)
}
  0x10   :  { %s663_s19 = smov 128   ;;  %s664_s20 = smov 8  }
  0x11   :  { %20 = dma.hbm_to_vmem [thread:$0]  %s758_s0, 256, %s15_s10, [#allocation3], %s663_s19, %s663_s19, %s664_s20  }
  0x12   :  { %s665_s23 = smov [#allocation4]   ;;  %s636_s27 = scalar_lea.hbm %s759_s1, 512 }
  0x13   :  { %s26_s24 = sshll.u32 %s665_s23, 4  ;;  %p637_p8 = scmp.ne.s32.totalorder %s759_s1, %s636_s27  ;;  %s27_s24 = int_to_ptr.vmem [resolvable:$true] %s26_s24 }
  0x14   :  { %p640_p9 = scmp.lt.u32.totalorder %s636_s27, %s759_s1 }
  0x16   :  { %p642_p10 = pnand %p640_p9, %p637_p8 }
  0x18   :  { %645 = shalt.err (!%p642_p10)
}
  0x19   :  { %s646_s4 = scalar_lea.vmem %s27_s24, 512  ;;  %p651_p12 = scmp.lt.s32.totalorder %s27_s24, %s27_s24 }
  0x1a   :  { %p647_p11 = scmp.ne.s32.totalorder %s27_s24, %s646_s4  ;;  %p652_p13 = scmp.lt.s32.totalorder %s646_s4, %s646_s4 }
  0x1c   :  { %p653_p0 = por %p652_p13, %p651_p12 }
  0x1e   :  { %p654_p1 = pnand %p653_p0, %p647_p11 }
  0x20   :  { %657 = shalt.err (!%p654_p1)
}
  0x21   :  { %32 = dma.hbm_to_vmem [thread:$0]  %s759_s1, 512, %s27_s24, [#allocation5], %s663_s19, %s663_s19, %s664_s20  }
  0x22   :  { %658 = dma.done.wait [#allocation3], 256  }
  0x23   :  { %659 = vsyncadd [#allocation3], 4294967040 }
  0x24   :  { %660 = dma.done.wait [#allocation5], 512  }
  0x25   :  { %661 = vsyncadd [#allocation5], 4294966784  ;;  %vm45_vm0 = vcmask 261120   ;;  %v41_v0 = vld [vmem:[#allocation4] sm:$0xff]  ;;  %v42_v1 = vld [vmem:[#allocation4 + $0x8] sm:$0xff]  ;;  %v666_v8 = vmov 0.0   ;;  %v282_v13 = vlaneseq }
  0x26   :  { %v43_v2 = vld [vmem:[#allocation4 + $0x10] sm:$0xff]  ;;  %v585_v3 = vpack.c.bf16 %v42_v1, %v41_v0  ;;  %v44_v4 = vld [vmem:[#allocation4 + $0x18] sm:$0xff]  ;;  %565 = vmatprep.subr.mxu1 %v666_v8  ;;  %vm667_vm1 = vmmov 0   ;;  %s668_s1 = smov 112   ;;  %vm130_vm2 = vcmask 130048   ;;  %vm291_vm4 = vcmask 64512  }
  0x27   :  { %v39_v5 = vld [vmem:[#allocation2] sm:$0xff]  ;;  %v589_v6 = vpack.c.bf16 %v44_v4, %v43_v2  ;;  %v40_v7 = vld [vmem:[#allocation2 + $0x8] sm:$0xff]  ;;  %567 = vmatprep.mubr.msk.f32.mxu1 %vm667_vm1, %v666_v8  ;;  %v283_v15 = vshrl.u32 %v282_v13, 7  ;;  %v285_v16 = vand.u32 127, %v282_v13  ;;  %s669_s6 = smov 96   ;;  %vm488_vm5 = vcmask 1044484  }
  0x28   :  { %562 = vmatprep.mubr.msk.f32.mxu0 %vm45_vm0, %v39_v5  ;;  %586 = vmatprep.subr.bf16.mxu0 %v585_v3  ;;  %vm474_vm6 = vcmask 1042434   ;;  %vm481_vm7 = vcmask 1043459   ;;  %vm495_vm8 = vcmask 1045509   ;;  %vm502_vm9 = vcmask 1046534   ;;  %s670_s7 = smov 48   ;;  %s671_s8 = smov 16  }
  0x29   :  { %588 = vmatpush3.bf16.msra.mxu0 %v585_v3  ;;  %vm286_vm3 = vcmp.le.s32.totalorder %v285_v16, %v283_v15  ;;  %vm509_vm10 = vcmask 1047559   ;;  %vm469_vm11 = vcmask 1041409   ;;  %vm472_vm12 = vcmask 123904   ;;  %s672_s11 = smov 32   ;;  %s673_s12 = smov 64  }
  0x2a   :  { %590 = vmatprep.subr.bf16.mxu0 %v589_v6  ;;  %s674_s13 = smov 80   ;;  %vm479_vm13 = vcmask 256129   ;;  %vm486_vm14 = vcmask 388354   ;;  %vm493_vm15 = vcmask 520579  }
  0x2d   :  { %592 = vmatpush3.bf16.msra.mxu0 %v589_v6 }
  0x2e   :  { %575 = vmatprep.subr.mxu0 %v666_v8 }
  0x30   :  { %563 = vmatmul.mubr.msk.f32.vlgmr.msra.gmra.mrb[0].mxu0 %vm45_vm0, %v40_v7  ;;  %vm500_vm0 = vcmask 652804  }
  0x31   :  { %577 = vmatprep.mubr.msk.f32.mxu0 %vm667_vm1, %v666_v8 }
 0x103   :  { %v564_v9 = vpop.f32.mrb[0].mxu0 }
 0x104   :  { %v118_v10 = vpop.f32.mrb[1].mxu0 }
 0x105   :  { %128 = vrot.lane.b32.xlu0 %v118_v10, %s668_s1 }
 0x109   :  { %206 = vrot.lane.b32.xlu0 %v564_v9, %s668_s1 }
 0x177   :  { %v129_v11 = vpop.permute.xlu0 %128 }
 0x178   :  { %566 = vmatpush3.xpose.msk.msra.mxu1 %vm130_vm2, %v129_v11 }
 0x179   :  { %570 = vmatprep.subr.mxu1 %v666_v8 }
 0x17b   :  { %568 = vmatmul.mubr.msk.f32.vlgmr.msra.gmra.mrb[0].mxu1 %vm130_vm2, %v118_v10  ;;  %v207_v12 = vpop.permute.xlu0 %206 }
 0x17c   :  { %571 = vmatpush3.xpose.msk.msra.mxu1 %vm130_vm2, %v207_v12  ;;  %572 = vmatprep.mubr.msk.f32.mxu1 %vm667_vm1, %v666_v8 }
 0x17d   :  { %580 = vmatprep.subr.mxu1 %v666_v8 }
 0x17f   :  { %573 = vmatmul.mubr.msk.f32.vlgmr.msra.gmra.mrb[2].mxu1 %vm130_vm2, %v564_v9  ;;  %vm514_vm2 = vcmask 917254  }
 0x180   :  { %582 = vmatprep.mubr.msk.f32.mxu1 %vm667_vm1, %v666_v8  ;;  %vm507_vm1 = vcmask 785029  }
 0x24e   :  { %v201_v14 = vpop.f32.mrb[0].mxu1 }
 0x24f   :  { %v569_v17 = vpop.f32.mrb[1].mxu1  ;;  %v289_v22 = vsel %vm286_vm3, %v201_v14, -1e+30 }
 0x250   :  { %v292_v23 = vsel %vm291_vm4, %v289_v22, -inf }
 0x252   :  { %v278_v18 = vpop.f32.mrb[2].mxu1 }
 0x253   :  { %v290_v19 = vsel %vm286_vm3, %v278_v18, -1e+30  ;;  %v574_v20 = vpop.f32.mrb[3].mxu1  ;;  %vm522_vm3 = vcmask 1048455  }
 0x254   :  { %v295_v21 = vsel %vm291_vm4, %v290_v19, -inf }
 0x255   :  { %296 = vmax.xlane.f32.xlu1 %v295_v21 }
 0x259   :  { %293 = vmax.xlane.f32.xlu1 %v292_v23 }
 0x2e2   :  { %v297_v24 = vpop.xlane.xlu1 %296 }
 0x2e3   :  { %v299_v25 = vsub.f32 %v290_v19, %v297_v24 }
 0x2e5   :  { %v302_v26 = vmul.f32 1.442695, %v299_v25 }
 0x2e6   :  { %v294_v27 = vpop.xlane.xlu1 %293 }
 0x2e7   :  { %606 = vpow2.f32 %v302_v26  ;;  %v298_v28 = vsub.f32 %v289_v22, %v294_v27 }
 0x2e9   :  { %v300_v29 = vmul.f32 1.442695, %v298_v28 }
 0x2eb   :  { %608 = vpow2.f32 %v300_v29 }
 0x2f1   :  { %v607_v30 = vpop.eup %606 }
 0x2f2   :  { %v307_v31 = vsel %vm291_vm4, %v607_v30, 0.0 }
 0x2f3   :  { %308 = vadd.xlane.f32.xlu0 %v307_v31 }
 0x2f5   :  { %v609_v32 = vpop.eup %608 }
 0x2f6   :  { %v304_v33 = vsel %vm291_vm4, %v609_v32, 0.0 }
 0x2f7   :  { %305 = vadd.xlane.f32.xlu1 %v304_v33 }
 0x308   :  { %390 = vrot.lane.b32.xlu1 %v564_v9, %s669_s6 }
 0x30c   :  { %314 = vrot.lane.b32.xlu1 %v118_v10, %s669_s6 }
 0x380   :  { %v309_v34 = vpop.xlane.xlu0 %308 }
 0x381   :  { %610 = vrcp.f32 %v309_v34 }
 0x384   :  { %v306_v35 = vpop.xlane.xlu1 %305 }
 0x385   :  { %612 = vrcp.f32 %v306_v35 }
 0x388   :  { %v391_v36 = vpop.permute.xlu1 %390 }
 0x389   :  { %581 = vmatpush3.msra.mxu1 %v391_v36 }
 0x38b   :  { %v611_v37 = vpop.eup %610 }
 0x38c   :  { %v313_v38 = vmul.f32 %v611_v37, %v607_v30  ;;  %v315_v39 = vpop.permute.xlu1 %314 }
 0x38d   :  { %576 = vmatpush3.msra.mxu0 %v315_v39 }
 0x38e   :  { %583 = vmatmul.mubr.msk.f32.vlgmr.msra.gmra.mrb[4].mxu1 %vm291_vm4, %v313_v38 }
 0x38f   :  { %v613_v40 = vpop.eup %612 }
 0x390   :  { %v311_v41 = vmul.f32 %v613_v40, %v609_v32 }
 0x392   :  { %578 = vmatmul.mubr.msk.f32.vlgmr.msra.gmra.mrb[2].mxu0 %vm291_vm4, %v311_v41  ;;  %vm524_vm4 = vcmask 1041280  }
 0x461   :  { %v462_v42 = vpop.f32.mrb[4].mxu1 }
 0x462   :  { %v584_v43 = vpop.f32.mrb[5].mxu1  ;;  %v468_v44 = vrot.slane %v462_v42, 7 }
 0x465   :  { %v386_v45 = vpop.f32.mrb[2].mxu0 }
 0x466   :  { %v579_v46 = vpop.f32.mrb[3].mxu0  ;;  %v489_v47 = vsel %vm488_vm5, %v468_v44, %v386_v45  ;;  %v475_v48 = vsel %vm474_vm6, %v468_v44, %v386_v45  ;;  %v482_v49 = vsel %vm481_vm7, %v468_v44, %v386_v45  ;;  %v496_v50 = vsel %vm495_vm8, %v468_v44, %v386_v45 }
 0x467   :  { %490 = vrot.lane.b32.xlu0 %v489_v47, %s670_s7  ;;  %476 = vrot.lane.b32.xlu1 %v475_v48, %s671_s8  ;;  %v503_v51 = vsel %vm502_vm9, %v468_v44, %v386_v45  ;;  %v510_v52 = vsel %vm509_vm10, %v468_v44, %v386_v45  ;;  %v470_v53 = vsel %vm469_vm11, %v468_v44, %v386_v45 }
 0x468   :  { %473 = vst.msk [vmem:[%s760_s2] sm:$0x3] %vm472_vm12, %v470_v53 }
 0x46b   :  { %483 = vrot.lane.b32.xlu1 %v482_v49, %s672_s11 }
 0x46f   :  { %516 = vrot.lane.b32.xlu1 %v386_v45, %s668_s1 }
 0x473   :  { %497 = vrot.lane.b32.xlu1 %v496_v50, %s673_s12 }
 0x477   :  { %504 = vrot.lane.b32.xlu1 %v503_v51, %s674_s13 }
 0x47b   :  { %511 = vrot.lane.b32.xlu1 %v510_v52, %s669_s6 }
 0x47f   :  { %518 = vrot.lane.b32.xlu1 %v468_v44, %s668_s1 }
 0x4d9   :  { %v477_v54 = vpop.permute.xlu1 %476  ;;  %v491_v56 = vpop.permute.xlu0 %490 }
 0x4da   :  { %480 = vst.msk [vmem:[%s760_s2 - $0x1] sm:$0x6] %vm479_vm13, %v477_v54 }
 0x4dd   :  { %v484_v55 = vpop.permute.xlu1 %483 }
 0x4de   :  { %487 = vst.msk [vmem:[%s760_s2 - $0x2] sm:$0xc] %vm486_vm14, %v484_v55 }
 0x4df   :  { %494 = vst.msk [vmem:[%s760_s2 - $0x3] sm:$0x18] %vm493_vm15, %v491_v56 }
 0x4e1   :  { %v517_v57 = vpop.permute.xlu1 %516 }
 0x4e5   :  { %v498_v58 = vpop.permute.xlu1 %497 }
 0x4e6   :  { %501 = vst.msk [vmem:[%s760_s2 - $0x4] sm:$0x30] %vm500_vm0, %v498_v58 }
 0x4e9   :  { %v505_v59 = vpop.permute.xlu1 %504 }
 0x4ea   :  { %508 = vst.msk [vmem:[%s760_s2 - $0x5] sm:$0x60] %vm507_vm1, %v505_v59 }
 0x4ed   :  { %v512_v60 = vpop.permute.xlu1 %511 }
 0x4ee   :  { %515 = vst.msk [vmem:[%s760_s2 - $0x6] sm:$0xc0] %vm514_vm2, %v512_v60 }
 0x4ef   :  { %523 = vst.msk [vmem:[%s760_s2 - $0x7] sm:$0x80] %vm522_vm3, %v517_v57 }
 0x4f1   :  { %v519_v61 = vpop.permute.xlu1 %518 }
 0x4f2   :  { %525 = vst.msk [vmem:[%s760_s2 + $0x1] sm:$0x1] %vm524_vm4, %v519_v61 }
 0x4f3   :  { %530 = vsyncpa [#allocation3], 1 }
 0x4f4   :  { %531 = vsyncpa [#allocation5], 1 }

</bundles_post_ra>
